<compile_context>
chip_gen: v6e
topology: v6e:2x2x1
jax: 0.10.0
libtpu: 0.0.40
codegen_flags: <defaults>
</compile_context>

<pallas_src>
import math

import jax
import jax.numpy as jnp
from jax import lax
from jax.experimental import pallas as pl
from jax.experimental.pallas import tpu as pltpu

_MIN_SUBLANES = {4: 8, 2: 16, 1: 32}      # itemsize -> minimum sublane tile
_TARGET_CHUNK_BYTES = 128 << 10           # per fori_loop store chunk (~32 vregs)
_TARGET_TILE_BYTES = 4 << 20              # per output buffer (double-buffered)


def _make_fill_kernel(block_rows, chunk_rows):
    """Kernel writing `block_rows` copies of the staged source rows.

    src_ref : (min(block_rows, chunk_rows), C) replicated table rows in VMEM.
    out_ref : (block_rows, C) output block, filled chunk_rows rows at a time.
    """
    n_full = block_rows // chunk_rows
    rem = block_rows - n_full * chunk_rows

    def kernel(src_ref, out_ref):
        src = src_ref[...]                      # pure vreg copies; no VPU broadcast
        if n_full == 1 and rem == 0:
            out_ref[...] = src
        elif n_full > 0:
            def body(c, carry):
                start = pl.multiple_of(c * chunk_rows, chunk_rows)
                out_ref[pl.ds(start, chunk_rows), :] = src
                return carry
            lax.fori_loop(0, n_full, body, 0, unroll=False)
        if rem > 0:
            out_ref[pl.ds(n_full * chunk_rows, rem), :] = src[:rem, :]

    return kernel


def _choose_block_rows(num_rows, chunk_rows, row_bytes, tile_bytes):
    """Largest per-block row count (multiple of chunk_rows) within the tile budget,
    clamped to num_rows and preferring a divisor of num_rows (no partial block)."""
    max_rows = max(chunk_rows, (tile_bytes // row_bytes) // chunk_rows * chunk_rows)
    if num_rows <= max_rows:
        return num_rows                      # full extent -> no divisibility rule
    d = max_rows
    while d >= chunk_rows:
        if num_rows % d == 0:
            return d                         # divisor: every grid step full-width
        d -= chunk_rows
    return max_rows                          # final block masked by Pallas (correct)


def position_embedding(x, emb_table, *, min_kernel_bytes=1 << 20,
                       tile_bytes=_TARGET_TILE_BYTES):
    """x: (B, S) integer array (only its shape is used, matching the module).
    emb_table: (N, H) float table with N >= S.  Returns (B, S, H)."""
    B, S = x.shape
    N, H = emb_table.shape
    assert S <= N, "sequence length must not exceed max_node_num + 2"

    dtype = emb_table.dtype
    itemsize = jnp.dtype(dtype).itemsize
    out_bytes = B * S * H * itemsize

    # Tiny outputs: pallas_call launch + pipeline prologue dominates; XLA's
    # broadcast hits the same HBM roofline with no kernel overhead.
    if out_bytes < min_kernel_bytes:
        return jnp.broadcast_to(emb_table[:S], (B, S, H))

    SH = S * H
    # Lane-dense output width: fold `m` consecutive batch elements into one
    # output row so the row width is a multiple of 128 lanes (full-width vst).
    # Falls back to width=SH (correct, masked tail vreg) if B lacks the factor.
    m_lane = 128 // math.gcd(SH, 128)
    m = m_lane if (m_lane > 1 and B % m_lane == 0) else 1
    C = m * SH
    R = B // m
    row_bytes = C * itemsize

    sub = _MIN_SUBLANES.get(itemsize, 8)
    chunk_rows = max(sub, (_TARGET_CHUNK_BYTES // row_bytes) // sub * sub)
    block_rows = _choose_block_rows(R, chunk_rows, row_bytes, tile_bytes)
    src_rows = min(block_rows, chunk_rows)

    # Stage only the first S table rows, pre-replicated to chunk height so the
    # kernel fill is whole-vreg copy + vst (no per-store sublane broadcast).
    pattern = emb_table[:S].reshape(1, SH)
    if m > 1:
        pattern = jnp.tile(pattern, (1, m))
    src = jnp.tile(pattern, (src_rows, 1))

    out_block_bytes = block_rows * row_bytes
    in_block_bytes = src_rows * row_bytes
    vmem_limit = int(max(2 * (out_block_bytes + in_block_bytes) + (2 << 20), 8 << 20))

    kernel = _make_fill_kernel(block_rows, chunk_rows)
    grid = (pl.cdiv(R, block_rows),)

    out_flat = pl.pallas_call(
        kernel,
        out_shape=jax.ShapeDtypeStruct((R, C), dtype),
        grid=grid,
        in_specs=[pl.BlockSpec((src_rows, C), lambda i: (0, 0))],
        out_specs=pl.BlockSpec((block_rows, C), lambda i: (i, 0)),
        compiler_params=pltpu.CompilerParams(
            # TODO(synk): switch to pltpu.CORE_PARALLEL on v7x (2 TCs/chip) once
            # verified that a single core cannot saturate the 3.2 TB/s writeback.
            dimension_semantics=("parallel",),
            vmem_limit_bytes=vmem_limit,
        ),
        cost_estimate=pl.CostEstimate(
            flops=0,
            transcendentals=0,
            bytes_accessed=out_bytes + src_rows * row_bytes,
        ),
    )(src)

    # (R, C) and (B, S, H) share the same contiguous flat layout -> free reshape.
    return out_flat.reshape(B, S, H)


if __name__ == "__main__":
    key = jax.random.PRNGKey(0)
    k_emb, k_x = jax.random.split(key)

    # Config consistent with the module: max_node_num=16 -> 18-row table, hidden=32.
    max_node_num, hidden_dim = 16, 32
    emb_table = jax.random.normal(
        k_emb, (max_node_num + 2, hidden_dim), dtype=jnp.float32
    )

    def reference(batch, seq):
        positions = jnp.broadcast_to(jnp.arange(seq), (batch, seq))
        return emb_table[positions]

    # 1) Module-sized input (batch=2, seq=8); force the Pallas path.
    x = jax.random.randint(k_x, (2, 8), 0, max_node_num, dtype=jnp.int32)
    out = jax.block_until_ready(position_embedding(x, emb_table, min_kernel_bytes=0))
    assert out.shape == (2, 8, hidden_dim)
    assert jnp.allclose(out, reference(2, 8)), "mismatch (small case)"

    # 2) S*H = 576 (not a multiple of 128): lane-dense refold path (m=2).
    x2 = jnp.zeros((10, 18), dtype=jnp.int32)
    out2 = jax.block_until_ready(position_embedding(x2, emb_table, min_kernel_bytes=0))
    assert jnp.allclose(out2, reference(10, 18)), "mismatch (unaligned SH case)"

    # 3) Larger batch with a small tile budget: exercises the fori_loop fill,
    #    a multi-step grid, and a masked partial final block.
    x3 = jnp.zeros((1000, 8), dtype=jnp.int32)
    out3 = jax.block_until_ready(
        position_embedding(x3, emb_table, min_kernel_bytes=0, tile_bytes=256 << 10)
    )
    assert jnp.allclose(out3, reference(1000, 8)), "mismatch (grid/loop case)"

    # 4) Default auto path: tiny output bypasses the kernel entirely.
    out4 = jax.block_until_ready(position_embedding(x, emb_table))
    assert jnp.allclose(out4, reference(2, 8)), "mismatch (bypass case)"

    print("KERNEL_OK")
</pallas_src>

<mosaic_0001>
module attributes {stable_mosaic.version = 11 : i64} {
  func.func @kernel(%arg0: i32, %arg1: memref<2x256xf32, #tpu.memory_space<vmem>>, %arg2: memref<2x256xf32, #tpu.memory_space<vmem>>) attributes {dimension_semantics = [#tpu.dimension_semantics<parallel>], iteration_bounds = array<i64: 1>, scalar_prefetch = 0 : i64, scratch_operands = 0 : i64, tpu.core_type = #tpu.core_type<tc>, window_params = [{pipeline_mode = #tpu.pipeline_mode<synchronous>, transform_indices = @transform_0, window_bounds = array<i64: 2, 256>}, {transform_indices = @transform_1, window_bounds = array<i64: 2, 256>}]} {
    %c0 = arith.constant 0 : index
    %c0_0 = arith.constant 0 : index
    %0 = vector.load %arg1[%c0, %c0_0] : memref<2x256xf32, #tpu.memory_space<vmem>>, vector<2x256xf32>
    %c0_1 = arith.constant 0 : index
    %c0_2 = arith.constant 0 : index
    %1 = vector.load %arg2[%c0_1, %c0_2] : memref<2x256xf32, #tpu.memory_space<vmem>>, vector<2x256xf32>
    tpu.vector_store %arg2[%c0_1, %c0_2], %0 {strides = array<i32>} : memref<2x256xf32, #tpu.memory_space<vmem>>, vector<2x256xf32>,
    return
  }
  func.func @transform_0(%arg0: i32) -> (i32, i32) {
    %c0_i32 = arith.constant 0 : i32
    %c0_i32_0 = arith.constant 0 : i32
    %c0_i32_1 = arith.constant 0 : i32
    return %c0_i32, %c0_i32_0 : i32, i32
  }
  func.func @transform_1(%arg0: i32) -> (i32, i32) {
    %c0_i32 = arith.constant 0 : i32
    %c0_i32_0 = arith.constant 0 : i32
    return %arg0, %c0_i32 : i32, i32
  }
}

</mosaic_0001>

<bundles_post_ra>
// kernel: tpu_custom_call.1
= control target key start
LH: loop header
LB: loop body
LE: loop exit
PB: predicated region body
PF: predicated region fallthrough
CT: control target
= control target key end

     0   :  { %6 = vsyncpa [#allocation3], 0  ;;  %s102_s0 = inlined_call_operand.hbm [shape: f32[2,256], index: 0, kind: input, shape index: {}]   ;;  %s103_s1 = inlined_call_operand.hbm [shape: f32[2,256], index: 1, kind: output, shape index: {}]  }
   0x1   :  { %7 = vsyncpa [#allocation4], 0  ;;  %s84_s6 = smov [#allocation2]  }
   0x2   :  { %s14_s7 = sshll.u32 %s84_s6, 4  ;;  %s15_s7 = int_to_ptr.vmem [resolvable:$true] %s14_s7 }
   0x3   :  { %s48_s8 = scalar_lea.vmem %s15_s7, 64  ;;  %p53_p1 = scmp.lt.s32.totalorder %s15_s7, %s15_s7 }
   0x4   :  { %p49_p0 = scmp.ne.s32.totalorder %s15_s7, %s48_s8  ;;  %p54_p2 = scmp.lt.s32.totalorder %s48_s8, %s48_s8 }
   0x6   :  { %p55_p3 = por %p54_p2, %p53_p1 }
   0x8   :  { %p56_p4 = pnand %p55_p3, %p49_p0 }
   0xa   :  { %59 = shalt.err (!%p56_p4)
}
   0xb   :  { %17 = dma.hbm_to_vmem [thread:$0]  %s102_s0, 64, %s15_s7, [#allocation3]  }
   0xc   :  { %80 = dma.done.wait [#allocation3], 64  }
   0xd   :  { %81 = vsyncadd [#allocation3], 4294967232  ;;  %s85_s11 = smov [#allocation5]   ;;  %v21_v0 = vld [vmem:[#allocation2] sm:$0xf] }
   0xe   :  { %s29_s12 = sshll.u32 %s85_s11, 4  ;;  %22 = vst [vmem:[#allocation5] sm:$0xf] %v21_v0  ;;  %s30_s12 = int_to_ptr.vmem [resolvable:$true] %s29_s12 }
   0xf   :  { %s60_s13 = scalar_lea.vmem %s30_s12, 64  ;;  %p65_p6 = scmp.lt.s32.totalorder %s30_s12, %s30_s12 }
  0x10   :  { %p61_p5 = scmp.ne.s32.totalorder %s30_s12, %s60_s13  ;;  %p66_p7 = scmp.lt.s32.totalorder %s60_s13, %s60_s13 }
  0x12   :  { %p67_p8 = por %p66_p7, %p65_p6 }
  0x14   :  { %p68_p9 = pnand %p67_p8, %p61_p5 }
  0x16   :  { %71 = shalt.err (!%p68_p9)
}
  0x17   :  { %32 = dma.vmem_to_hbm [thread:$0]  %s30_s12, 64, %s103_s1, [#allocation4]  }
  0x18   :  { %82 = dma.done.wait [#allocation4], 64  }
  0x19   :  { %83 = vsyncadd [#allocation4], 4294967232 }
  0x1a   :  { %36 = vsyncpa [#allocation3], 1 }
  0x1b   :  { %37 = vsyncpa [#allocation4], 1 }

</bundles_post_ra>
